<compile_context>
chip_gen: v5e
topology: v5e:2x2
jax: 0.10.0
libtpu: 0.0.40
codegen_flags: <defaults>
</compile_context>

<pallas_src>
from functools import partial

import jax
import jax.numpy as jnp
from jax.experimental import pallas as pl
from jax.experimental.pallas import tpu as pltpu


def row_norms_kernel(x_ref, o_ref):
    """Per-row L2 norms of one tile.

    x_ref: VMEM (tile_rows, D) tile of the feature matrix (any float dtype)
    o_ref: VMEM (1, tile_rows) f32 lane-dense norms for this tile
    """
    x = x_ref[...].astype(jnp.float32)
    sq = jnp.sum(x * x, axis=1)              # (tile_rows,) per-row squared sums
    o_ref[...] = jnp.sqrt(sq)[None, :]       # lane-dense (1, tile_rows) store


def _vmem_policy():
    """(target bytes per x tile buffer, scoped VMEM limit) for this TPU."""
    phys = 64 * 1024 * 1024                  # conservative default (v7x per-core VMEM)
    try:
        phys = int(getattr(pltpu.get_tpu_info(), "vmem_capacity_bytes", phys))
    except Exception:
        pass
    if phys >= 128 * 1024 * 1024:            # v5e / v6e: 128 MiB physical VMEM
        return 16 * 1024 * 1024, 64 * 1024 * 1024
    return 10 * 1024 * 1024, 44 * 1024 * 1024   # v7x-class: 64 MiB physical VMEM


def _choose_tile_rows(n_rows, n_feat, itemsize, target_bytes):
    """Row-tile size: multiple of 128, sized to ~target_bytes, capped at 32K."""
    if n_rows <= 128:
        return int(n_rows)                   # single full-array block
    rows = max(target_bytes // max(n_feat * itemsize, 1), 128)
    rows = min(rows, 32 * 1024)              # perf review: old 1024-row cap removed
    rows = min(rows, (n_rows // 128) * 128)  # keep the block within the array rows
    rows = max((rows // 128) * 128, 128)     # lane-dense output + sublane packing
    return int(rows)


@partial(jax.jit, static_argnames=("loss_weight", "loss_type", "tile_rows"))
def ring_loss(x, radius, *, loss_weight=1.0, loss_type="auto", tile_rows=None):
    """x: (N, D) float array (f32 or bf16); radius: (1,) float32 parameter.

    Returns (loss_scalar, new_radius (1,)) mirroring the stateful PyTorch
    module (the radius fill-if-negative side effect is returned explicitly).
    """
    n, d = x.shape
    itemsize = jnp.dtype(x.dtype).itemsize
    target_bytes, vmem_limit = _vmem_policy()

    if tile_rows is None:
        tile_rows = _choose_tile_rows(n, d, itemsize, target_bytes)
    else:
        tile_rows = int(tile_rows)
        if n > 128:
            tile_rows = max(128, (tile_rows // 128) * 128)
            tile_rows = min(tile_rows, (n // 128) * 128)
        else:
            tile_rows = n

    n_tiles = (n + tile_rows - 1) // tile_rows

    cost = pl.CostEstimate(
        flops=2 * n * d + 2 * n,
        transcendentals=n,                               # one sqrt per row
        bytes_accessed=n * d * itemsize + n_tiles * tile_rows * 4,
    )

    # Single streaming pass over x; each grid step is independent so the axis
    # is "parallel" (sharded across both TensorCores on v7x).
    norms_tiles = pl.pallas_call(
        row_norms_kernel,
        out_shape=jax.ShapeDtypeStruct((n_tiles, tile_rows), jnp.float32),
        grid=(n_tiles,),
        in_specs=[pl.BlockSpec((tile_rows, d), lambda i: (i, 0))],
        out_specs=pl.BlockSpec((1, tile_rows), lambda i: (i, 0)),
        compiler_params=pltpu.CompilerParams(
            dimension_semantics=("parallel",),
            vmem_limit_bytes=vmem_limit,
        ),
        cost_estimate=cost,
    )(x)

    # Drop the (garbage) rows of a partial boundary tile before any reduction.
    norms = norms_tiles.reshape(-1)[:n]

    # --- O(N) finalize in plain JAX (matches the PyTorch forward exactly) ---
    mean_norm = jnp.mean(norms)
    r_in = radius[0].astype(jnp.float32)
    r = jnp.where(r_in < 0.0, mean_norm, r_in)   # if radius < 0: fill with mean
    w = jnp.float32(loss_weight)

    if loss_type == "l1":
        dlt = jnp.abs(norms - r)
        sl1 = jnp.where(dlt < 1.0, 0.5 * dlt * dlt, dlt - 0.5)
        # smooth_l1(x, r) + smooth_l1(r, x) == 2 * smooth_l1(x, r)
        loss = 2.0 * jnp.mean(sl1) * w
    elif loss_type == "auto":
        diff = (norms - r) / jnp.maximum(mean_norm, 0.5)
        loss = jnp.mean(diff * diff) * w
    else:  # 'l2'
        diff = norms - r
        loss = jnp.mean(diff * diff) * w

    return loss, jnp.reshape(r, (1,))


def ring_loss_reference(x, radius, *, loss_weight=1.0, loss_type="auto"):
    """Pure-JAX reference mirroring the PyTorch forward."""
    norms = jnp.sqrt(jnp.sum(jnp.square(x.astype(jnp.float32)), axis=1))
    mean_norm = jnp.mean(norms)
    r = jnp.where(radius[0] < 0.0, mean_norm, radius[0])
    if loss_type == "l1":
        d = jnp.abs(norms - r)
        sl1 = jnp.where(d < 1.0, 0.5 * d * d, d - 0.5)
        return 2.0 * jnp.mean(sl1) * loss_weight
    elif loss_type == "auto":
        diff = (norms - r) / jnp.maximum(mean_norm, 0.5)
        return jnp.mean(diff * diff) * loss_weight
    diff = norms - r
    return jnp.mean(diff * diff) * loss_weight


if __name__ == "__main__":
    key = jax.random.PRNGKey(0)
    k1, k2, k3, k4 = jax.random.split(key, 4)

    # Case 1: default 'auto', uninitialized radius (-1): exercises the fill rule.
    x1 = jax.random.normal(k1, (8, 32), dtype=jnp.float32)
    r1 = jnp.full((1,), -1.0, dtype=jnp.float32)
    loss1, new_r1 = ring_loss(x1, r1, loss_weight=1.0, loss_type="auto")
    ref1 = ring_loss_reference(x1, r1, loss_weight=1.0, loss_type="auto")

    # Case 2: 'l2' with an already-initialized (positive) radius.
    x2 = 2.0 * jax.random.normal(k2, (8, 32), dtype=jnp.float32)
    r2 = jnp.full((1,), 3.0, dtype=jnp.float32)
    loss2, _ = ring_loss(x2, r2, loss_weight=0.01, loss_type="l2")
    ref2 = ring_loss_reference(x2, r2, loss_weight=0.01, loss_type="l2")

    # Case 3: 'l1', N=200 not a multiple of the 128-row tile -> exercises the
    # multi-tile "parallel" grid and the partial boundary block.
    x3 = jax.random.normal(k3, (200, 64), dtype=jnp.float32)
    r3 = jnp.full((1,), -1.0, dtype=jnp.float32)
    loss3, _ = ring_loss(x3, r3, loss_weight=0.01, loss_type="l1", tile_rows=128)
    ref3 = ring_loss_reference(x3, r3, loss_weight=0.01, loss_type="l1")

    # Case 4: bf16 features (kernel upcasts per tile), multi-tile + boundary.
    x4 = jax.random.normal(k4, (144, 128), dtype=jnp.float32).astype(jnp.bfloat16)
    r4 = jnp.full((1,), -1.0, dtype=jnp.float32)
    loss4, _ = ring_loss(x4, r4, loss_weight=1.0, loss_type="auto")
    ref4 = ring_loss_reference(x4, r4, loss_weight=1.0, loss_type="auto")

    for got, ref in ((loss1, ref1), (loss2, ref2), (loss3, ref3), (loss4, ref4)):
        got = jax.block_until_ready(got)
        assert jnp.allclose(got, ref, atol=1e-4, rtol=1e-4), (got, ref)

    new_r1 = jax.block_until_ready(new_r1)
    exp_r1 = jnp.mean(jnp.sqrt(jnp.sum(jnp.square(x1), axis=1)))
    assert jnp.allclose(new_r1[0], exp_r1, atol=1e-4, rtol=1e-4), (new_r1, exp_r1)

    print("KERNEL_OK")
</pallas_src>

<mosaic_0001>
module attributes {stable_mosaic.version = 11 : i64} {
  func.func @row_norms_kernel(%arg0: i32, %arg1: memref<8x32xf32, #tpu.memory_space<vmem>>, %arg2: memref<1x8xf32, #tpu.memory_space<vmem>>) attributes {dimension_semantics = [#tpu.dimension_semantics<parallel>], iteration_bounds = array<i64: 1>, scalar_prefetch = 0 : i64, scratch_operands = 0 : i64, tpu.core_type = #tpu.core_type<tc>, window_params = [{transform_indices = @transform_0, window_bounds = array<i64: 8, 32>}, {transform_indices = @transform_1, window_bounds = array<i64: 1, 8>}]} {
    %c0 = arith.constant 0 : index
    %c0_0 = arith.constant 0 : index
    %0 = vector.load %arg1[%c0, %c0_0] : memref<8x32xf32, #tpu.memory_space<vmem>>, vector<8x32xf32>
    %1 = arith.mulf %0, %0 : vector<8x32xf32>
    %cst = arith.constant dense<0.000000e+00> : vector<8xf32>
    %2 = vector.multi_reduction <add>, %1, %cst [1] : vector<8x32xf32> to vector<8xf32>
    %3 = math.sqrt %2 : vector<8xf32>
    %4 = vector.shape_cast %3 : vector<8xf32> to vector<1x8xf32>
    %c0_1 = arith.constant 0 : index
    %c0_2 = arith.constant 0 : index
    %5 = vector.load %arg2[%c0_1, %c0_2] : memref<1x8xf32, #tpu.memory_space<vmem>>, vector<1x8xf32>
    tpu.vector_store %arg2[%c0_1, %c0_2], %4 {strides = array<i32>} : memref<1x8xf32, #tpu.memory_space<vmem>>, vector<1x8xf32>,
    return
  }
  func.func @transform_0(%arg0: i32) -> (i32, i32) {
    %c0_i32 = arith.constant 0 : i32
    %c0_i32_0 = arith.constant 0 : i32
    return %arg0, %c0_i32 : i32, i32
  }
  func.func @transform_1(%arg0: i32) -> (i32, i32) {
    %c0_i32 = arith.constant 0 : i32
    %c0_i32_0 = arith.constant 0 : i32
    return %arg0, %c0_i32 : i32, i32
  }
}

</mosaic_0001>

<bundles_post_ra>
// kernel: ring_loss.1
= control target key start
LH: loop header
LB: loop body
LE: loop exit
PB: predicated region body
PF: predicated region fallthrough
CT: control target
= control target key end

     0   :  { %6 = vsyncpa [#allocation3], 0  ;;  %s81_s9 = smov [#allocation2]   ;;  %s98_s0 = inlined_call_operand.hbm [shape: f32[8,32], index: 0, kind: input, shape index: {}]   ;;  %s99_s1 = inlined_call_operand.vmem [shape: f32[1,8], index: 1, kind: output, shape index: {}]  }
   0x1   :  { %s12_s8 = sshll.u32 %s98_s0, 4  ;;  %s14_s10 = sshll.u32 %s81_s9, 4  ;;  %s13_s8 = int_to_ptr.hbm [resolvable:$true] %s12_s8  ;;  %s15_s10 = int_to_ptr.vmem [resolvable:$true] %s14_s10 }
   0x2   :  { %17 = dma.hbm_to_vmem [thread:$0]  %s13_s8, 128, %s15_s10, [#allocation3]  }
   0x3   :  { %79 = dma.done.wait [#allocation3], 128  }
   0x4   :  { %80 = vsyncadd [#allocation3], 4294967168  ;;  %v22_v0 = vld [vmem:[#allocation2] sm:$0xff]  ;;  %vm24_vm0 = vcmask 261120   ;;  %v41_v9 = vlaneseq  ;;  %vm45_vm3 = vcmask 57344  }
   0x5   :  { %v23_v1 = vmul.f32 %v22_v0, %v22_v0 }
   0x6   :  { %v42_v12 = vand.u32 127, %v41_v9 }
   0x7   :  { %v25_v2 = vsel %vm24_vm0, %v23_v1, 0.0 }
   0x8   :  { %26 = vadd.xlane.f32.xlu0 %v25_v2 }
  0x7b   :  { %v27_v3 = vpop.xlane.xlu0 %26 }
  0x7c   :  { %53 = vrsqrt.f32 %v27_v3  ;;  %vm35_vm1 = vcmp.eq.f32.partialorder %v27_v3, inf  ;;  %v38_v13 = vand.u32 2147483648, %v27_v3  ;;  %vm37_vm2 = vcmp.eq.f32.partialorder %v27_v3, 0.0 }
  0x82   :  { %v54_v4 = vpop.eup %53 }
  0x83   :  { %v29_v5 = vmul.f32 %v54_v4, %v27_v3 }
  0x85   :  { %v30_v6 = vmul.f32 %v54_v4, %v29_v5 }
  0x87   :  { %v31_v7 = vmul.f32 0.5, %v30_v6 }
  0x89   :  { %v32_v8 = vsub.f32 1.5, %v31_v7 }
  0x8b   :  { %v33_v10 = vmul.f32 %v54_v4, %v32_v8 }
  0x8d   :  { %v34_v11 = vmul.f32 %v33_v10, %v27_v3 }
  0x8f   :  { %v36_v14 = vsel %vm35_vm1, %v27_v3, %v34_v11 }
  0x90   :  { %v39_v15 = vsel %vm37_vm2, %v38_v13, %v36_v14 }
  0x91   :  { %v43_v16 = vperm.slane %v39_v15, %v42_v12 }
  0x93   :  { %46 = vst.msk [vmem:[%s99_s1] sm:$0x1] %vm45_vm3, %v43_v16 }
  0x94   :  { %51 = vsyncpa [#allocation3], 1 }

</bundles_post_ra>
